<compile_context>
chip_gen: v5e
topology: v5e:2x2
jax: 0.10.0
libtpu: 0.0.40
codegen_flags: <defaults>
</compile_context>

<pallas_src>
import functools

import jax
import jax.numpy as jnp
from jax.experimental import pallas as pl
from jax.experimental.pallas import tpu as pltpu


def _round_up(n: int, m: int) -> int:
    return ((n + m - 1) // m) * m


def two_layer_net_kernel(x_ref, w1_ref, b1_ref, w2_ref, b2_ref, o_ref):
    # One batch tile: both matmuls + bias + ReLU fused, fp32 accumulation.
    x = x_ref[...]
    h = jnp.dot(x, w1_ref[...], preferred_element_type=jnp.float32) + b1_ref[...]
    h_relu = jnp.maximum(h, 0.0)  # .clamp(min=0)
    y = jnp.dot(h_relu, w2_ref[...], preferred_element_type=jnp.float32) + b2_ref[...]
    o_ref[...] = y.astype(o_ref.dtype)


@functools.partial(jax.jit, static_argnames=("tile_n",))
def two_layer_net(x, w1, b1, w2, b2, *, tile_n: int = 512):
    """x: [N, D_in]; w1: [D_in, H]; b1: [H] or [1, H]; w2: [H, D_out]; b2: [D_out] or [1, D_out]."""
    N, D_in = x.shape
    H = w1.shape[1]
    D_out = w2.shape[1]

    b1 = b1.reshape(1, H)
    b2 = b2.reshape(1, D_out)

    # --- lane/tile alignment: pad feature dims to 128, batch to the tile size.
    D_in_p = _round_up(D_in, 128)
    H_p = _round_up(H, 128)
    D_out_p = _round_up(D_out, 128)
    # Large tiles amortize per-step overhead; shrink for small problems so we
    # don't pad the batch way past N.
    tn = min(tile_n, _round_up(N, 128))
    N_p = _round_up(N, tn)

    xp = jnp.pad(x, ((0, N_p - N), (0, D_in_p - D_in)))
    w1p = jnp.pad(w1, ((0, D_in_p - D_in), (0, H_p - H)))
    b1p = jnp.pad(b1, ((0, 0), (0, H_p - H)))
    w2p = jnp.pad(w2, ((0, H_p - H), (0, D_out_p - D_out)))
    b2p = jnp.pad(b2, ((0, 0), (0, D_out_p - D_out)))

    grid = (N_p // tn,)

    # --- VMEM budget (fp32): resident weights/biases + double-buffered x/out
    #     tiles + the fused hidden intermediate.  Explicit so v7x (64 MiB) does
    #     not silently spill.
    f32 = 4
    resident = (D_in_p * H_p + H_p * D_out_p + H_p + D_out_p) * f32
    per_step = (2 * tn * D_in_p + 2 * tn * D_out_p + tn * H_p) * f32
    vmem_limit = min(max(int(1.5 * (resident + per_step)) + (4 << 20), 32 << 20), 64 << 20)

    cost = pl.CostEstimate(
        flops=2 * N_p * (D_in_p * H_p + H_p * D_out_p),
        transcendentals=0,
        bytes_accessed=(xp.size + w1p.size + w2p.size + b1p.size + b2p.size
                        + N_p * D_out_p) * f32,
    )

    out_p = pl.pallas_call(
        two_layer_net_kernel,
        out_shape=jax.ShapeDtypeStruct((N_p, D_out_p), x.dtype),
        grid_spec=pltpu.PrefetchScalarGridSpec(
            num_scalar_prefetch=0,
            grid=grid,
            in_specs=[
                pl.BlockSpec((tn, D_in_p), lambda i: (i, 0)),      # x: streamed over batch
                pl.BlockSpec((D_in_p, H_p), lambda i: (0, 0)),     # w1: resident
                pl.BlockSpec((1, H_p), lambda i: (0, 0)),          # b1: resident
                pl.BlockSpec((H_p, D_out_p), lambda i: (0, 0)),    # w2: resident
                pl.BlockSpec((1, D_out_p), lambda i: (0, 0)),      # b2: resident
            ],
            out_specs=pl.BlockSpec((tn, D_out_p), lambda i: (i, 0)),
        ),
        compiler_params=pltpu.CompilerParams(
            dimension_semantics=("parallel",),
            vmem_limit_bytes=vmem_limit,
        ),
        cost_estimate=cost,
    )(xp, w1p, b1p, w2p, b2p)

    # Slice away batch/feature padding.
    return out_p[:N, :D_out]


def init_linear_params(key, fan_in, fan_out):
    """Mirror torch.nn.Linear default init U(-1/sqrt(fan_in), 1/sqrt(fan_in)).
    Weight returned pre-transposed to [fan_in, fan_out]."""
    bound = 1.0 / jnp.sqrt(jnp.float32(fan_in))
    kw, kb = jax.random.split(key)
    w = jax.random.uniform(kw, (fan_in, fan_out), jnp.float32, -bound, bound)
    b = jax.random.uniform(kb, (1, fan_out), jnp.float32, -bound, bound)
    return w, b


if __name__ == "__main__":
    # Small shapes consistent with the module's forward: x is [N, D_in].
    N, D_in, H, D_out = 64, 32, 64, 16

    key = jax.random.PRNGKey(0)
    kx, k1, k2 = jax.random.split(key, 3)

    x = jax.random.normal(kx, (N, D_in), jnp.float32)
    w1, b1 = init_linear_params(k1, D_in, H)
    w2, b2 = init_linear_params(k2, H, D_out)

    y = two_layer_net(x, w1, b1, w2, b2)
    jax.block_until_ready(y)

    # Pure-JAX reference check of forward semantics.
    h_ref = jnp.maximum(x @ w1 + b1, 0.0)
    y_ref = h_ref @ w2 + b2
    assert y.shape == (N, D_out)
    assert jnp.allclose(y, y_ref, atol=1e-5, rtol=1e-5)

    print("KERNEL_OK")
</pallas_src>

<mosaic_0001>
module attributes {stable_mosaic.version = 11 : i64} {
  func.func @two_layer_net_kernel(%arg0: i32, %arg1: memref<128x128xf32, #tpu.memory_space<vmem>>, %arg2: memref<128x128xf32, #tpu.memory_space<vmem>>, %arg3: memref<1x128xf32, #tpu.memory_space<vmem>>, %arg4: memref<128x128xf32, #tpu.memory_space<vmem>>, %arg5: memref<1x128xf32, #tpu.memory_space<vmem>>, %arg6: memref<128x128xf32, #tpu.memory_space<vmem>>) attributes {dimension_semantics = [#tpu.dimension_semantics<parallel>], iteration_bounds = array<i64: 1>, scalar_prefetch = 0 : i64, scratch_operands = 0 : i64, tpu.core_type = #tpu.core_type<tc>, window_params = [{transform_indices = @transform_0, window_bounds = array<i64: 128, 128>}, {pipeline_mode = #tpu.pipeline_mode<synchronous>, transform_indices = @transform_1, window_bounds = array<i64: 128, 128>}, {pipeline_mode = #tpu.pipeline_mode<synchronous>, transform_indices = @transform_2, window_bounds = array<i64: 1, 128>}, {pipeline_mode = #tpu.pipeline_mode<synchronous>, transform_indices = @transform_3, window_bounds = array<i64: 128, 128>}, {pipeline_mode = #tpu.pipeline_mode<synchronous>, transform_indices = @transform_4, window_bounds = array<i64: 1, 128>}, {transform_indices = @transform_5, window_bounds = array<i64: 128, 128>}]} {
    %c0 = arith.constant 0 : index
    %c0_0 = arith.constant 0 : index
    %0 = vector.load %arg1[%c0, %c0_0] : memref<128x128xf32, #tpu.memory_space<vmem>>, vector<128x128xf32>
    %c0_1 = arith.constant 0 : index
    %c0_2 = arith.constant 0 : index
    %1 = vector.load %arg2[%c0_1, %c0_2] : memref<128x128xf32, #tpu.memory_space<vmem>>, vector<128x128xf32>
    %cst = arith.constant dense<0.000000e+00> : vector<128x128xf32>
    %2 = tpu.matmul %0, %1, %cst {dimension_numbers = #tpu.dot_dimension_numbers<[1], [0], [0], [1], [0, 0, 1, 1], [], []>} : vector<128x128xf32>, vector<128x128xf32>, vector<128x128xf32> -> vector<128x128xf32>
    %c0_3 = arith.constant 0 : index
    %c0_4 = arith.constant 0 : index
    %3 = vector.load %arg3[%c0_3, %c0_4] : memref<1x128xf32, #tpu.memory_space<vmem>>, vector<1x128xf32>
    %4 = vector.broadcast %3 : vector<1x128xf32> to vector<128x128xf32>
    %5 = arith.addf %2, %4 : vector<128x128xf32>
    %cst_5 = arith.constant 0.000000e+00 : f32
    %6 = vector.broadcast %cst_5 : f32 to vector<128x128xf32>
    %7 = arith.maximumf %5, %6 : vector<128x128xf32>
    %c0_6 = arith.constant 0 : index
    %c0_7 = arith.constant 0 : index
    %8 = vector.load %arg4[%c0_6, %c0_7] : memref<128x128xf32, #tpu.memory_space<vmem>>, vector<128x128xf32>
    %cst_8 = arith.constant dense<0.000000e+00> : vector<128x128xf32>
    %9 = tpu.matmul %7, %8, %cst_8 {dimension_numbers = #tpu.dot_dimension_numbers<[1], [0], [0], [1], [0, 0, 1, 1], [], []>} : vector<128x128xf32>, vector<128x128xf32>, vector<128x128xf32> -> vector<128x128xf32>
    %c0_9 = arith.constant 0 : index
    %c0_10 = arith.constant 0 : index
    %10 = vector.load %arg5[%c0_9, %c0_10] : memref<1x128xf32, #tpu.memory_space<vmem>>, vector<1x128xf32>
    %11 = vector.broadcast %10 : vector<1x128xf32> to vector<128x128xf32>
    %12 = arith.addf %9, %11 : vector<128x128xf32>
    %c0_11 = arith.constant 0 : index
    %c0_12 = arith.constant 0 : index
    %13 = vector.load %arg6[%c0_11, %c0_12] : memref<128x128xf32, #tpu.memory_space<vmem>>, vector<128x128xf32>
    tpu.vector_store %arg6[%c0_11, %c0_12], %12 {strides = array<i32>} : memref<128x128xf32, #tpu.memory_space<vmem>>, vector<128x128xf32>,
    return
  }
  func.func @transform_0(%arg0: i32) -> (i32, i32) {
    %c0_i32 = arith.constant 0 : i32
    %c0_i32_0 = arith.constant 0 : i32
    return %arg0, %c0_i32 : i32, i32
  }
  func.func @transform_1(%arg0: i32) -> (i32, i32) {
    %c0_i32 = arith.constant 0 : i32
    %c0_i32_0 = arith.constant 0 : i32
    %c0_i32_1 = arith.constant 0 : i32
    return %c0_i32, %c0_i32_0 : i32, i32
  }
  func.func @transform_2(%arg0: i32) -> (i32, i32) {
    %c0_i32 = arith.constant 0 : i32
    %c0_i32_0 = arith.constant 0 : i32
    %c0_i32_1 = arith.constant 0 : i32
    return %c0_i32, %c0_i32_0 : i32, i32
  }
  func.func @transform_3(%arg0: i32) -> (i32, i32) {
    %c0_i32 = arith.constant 0 : i32
    %c0_i32_0 = arith.constant 0 : i32
    %c0_i32_1 = arith.constant 0 : i32
    return %c0_i32, %c0_i32_0 : i32, i32
  }
  func.func @transform_4(%arg0: i32) -> (i32, i32) {
    %c0_i32 = arith.constant 0 : i32
    %c0_i32_0 = arith.constant 0 : i32
    %c0_i32_1 = arith.constant 0 : i32
    return %c0_i32, %c0_i32_0 : i32, i32
  }
  func.func @transform_5(%arg0: i32) -> (i32, i32) {
    %c0_i32 = arith.constant 0 : i32
    %c0_i32_0 = arith.constant 0 : i32
    return %arg0, %c0_i32 : i32, i32
  }
}

</mosaic_0001>

<bundles_post_ra>
// kernel: two_layer_net.1
= control target key start
LH: loop header
LB: loop body
LE: loop exit
PB: predicated region body
PF: predicated region fallthrough
CT: control target
= control target key end

     0   :  { %s504_s1 = inlined_call_operand.vmem [shape: f32[128,128], index: 1, kind: input, shape index: {}]   ;;  %s505_s2 = inlined_call_operand.vmem [shape: f32[1,128], index: 2, kind: input, shape index: {}]   ;;  %s506_s0 = inlined_call_operand.vmem [shape: f32[128,128], index: 0, kind: input, shape index: {}]   ;;  %s507_s3 = inlined_call_operand.vmem [shape: f32[128,128], index: 3, kind: input, shape index: {}]   ;;  %s508_s4 = inlined_call_operand.vmem [shape: f32[1,128], index: 4, kind: input, shape index: {}]   ;;  %s509_s5 = inlined_call_operand.vmem [shape: f32[128,128], index: 5, kind: output, shape index: {}]  }
   0x1   :  { %v51_v0 = vld [vmem:[%s504_s1 + $0x78] sm:$0xff]  ;;  %v50_v1 = vld [vmem:[%s504_s1 + $0x70] sm:$0xff]  ;;  %v49_v2 = vld [vmem:[%s504_s1 + $0x68] sm:$0xff] }
   0x2   :  { %242 = vmatpush.msra.mxu2 %v51_v0  ;;  %56 = vmatpush.msra.mxu0 %v51_v0  ;;  %v48_v3 = vld [vmem:[%s504_s1 + $0x60] sm:$0xff]  ;;  %v47_v4 = vld [vmem:[%s504_s1 + $0x58] sm:$0xff]  ;;  %v46_v5 = vld [vmem:[%s504_s1 + $0x50] sm:$0xff] }
   0x3   :  { %v45_v6 = vld [vmem:[%s504_s1 + $0x48] sm:$0xff]  ;;  %v44_v7 = vld [vmem:[%s504_s1 + $0x40] sm:$0xff]  ;;  %v43_v8 = vld [vmem:[%s504_s1 + $0x38] sm:$0xff] }
   0x4   :  { %243 = vmatpush.msra.mxu2 %v50_v1  ;;  %57 = vmatpush.msra.mxu0 %v50_v1  ;;  %v42_v9 = vld [vmem:[%s504_s1 + $0x30] sm:$0xff]  ;;  %v41_v10 = vld [vmem:[%s504_s1 + $0x28] sm:$0xff]  ;;  %v40_v11 = vld [vmem:[%s504_s1 + $0x20] sm:$0xff] }
   0x5   :  { %v39_v12 = vld [vmem:[%s504_s1 + $0x18] sm:$0xff]  ;;  %v38_v13 = vld [vmem:[%s504_s1 + $0x10] sm:$0xff]  ;;  %v37_v14 = vld [vmem:[%s504_s1 + $0x8] sm:$0xff] }
   0x6   :  { %244 = vmatpush.msra.mxu2 %v49_v2  ;;  %58 = vmatpush.msra.mxu0 %v49_v2  ;;  %v36_v15 = vld [vmem:[%s504_s1] sm:$0xff]  ;;  %v29_v18 = vld [vmem:[%s506_s0 + $0x48] sm:$0xff]  ;;  %v30_v20 = vld [vmem:[%s506_s0 + $0x50] sm:$0xff] }
   0x7   :  { %v28_v16 = vld [vmem:[%s506_s0 + $0x40] sm:$0xff]  ;;  %v21_v19 = vld [vmem:[%s506_s0 + $0x8] sm:$0xff]  ;;  %v22_v21 = vld [vmem:[%s506_s0 + $0x10] sm:$0xff] }
   0x8   :  { %245 = vmatpush.msra.mxu2 %v48_v3  ;;  %59 = vmatpush.msra.mxu0 %v48_v3  ;;  %v20_v17 = vld [vmem:[%s506_s0] sm:$0xff]  ;;  %v31_v22 = vld [vmem:[%s506_s0 + $0x58] sm:$0xff]  ;;  %v151_v25 = vld [vmem:[%s507_s3 + $0x70] sm:$0xff] }
   0x9   :  { %v23_v23 = vld [vmem:[%s506_s0 + $0x18] sm:$0xff]  ;;  %v150_v26 = vld [vmem:[%s507_s3 + $0x68] sm:$0xff]  ;;  %v149_v27 = vld [vmem:[%s507_s3 + $0x60] sm:$0xff] }
   0xa   :  { %246 = vmatpush.msra.mxu2 %v47_v4  ;;  %60 = vmatpush.msra.mxu0 %v47_v4  ;;  %v152_v24 = vld [vmem:[%s507_s3 + $0x78] sm:$0xff]  ;;  %v32_v28 = vld [vmem:[%s506_s0 + $0x60] sm:$0xff]  ;;  %v147_v31 = vld [vmem:[%s507_s3 + $0x50] sm:$0xff] }
   0xb   :  { %258 = vmatpush.msra.mxu3 %v152_v24  ;;  %157 = vmatpush.msra.mxu1 %v152_v24  ;;  %v24_v29 = vld [vmem:[%s506_s0 + $0x20] sm:$0xff]  ;;  %v148_v30 = vld [vmem:[%s507_s3 + $0x58] sm:$0xff]  ;;  %v146_v32 = vld [vmem:[%s507_s3 + $0x48] sm:$0xff] }
   0xc   :  { %247 = vmatpush.msra.mxu2 %v46_v5  ;;  %61 = vmatpush.msra.mxu0 %v46_v5  ;;  %v145_v33 = vld [vmem:[%s507_s3 + $0x40] sm:$0xff]  ;;  %v33_v34 = vld [vmem:[%s506_s0 + $0x68] sm:$0xff]  ;;  %v144_v36 = vld [vmem:[%s507_s3 + $0x38] sm:$0xff] }
   0xd   :  { %259 = vmatpush.msra.mxu3 %v151_v25  ;;  %158 = vmatpush.msra.mxu1 %v151_v25  ;;  %v25_v35 = vld [vmem:[%s506_s0 + $0x28] sm:$0xff]  ;;  %v143_v37 = vld [vmem:[%s507_s3 + $0x30] sm:$0xff]  ;;  %v141_v39 = vld [vmem:[%s507_s3 + $0x20] sm:$0xff] }
   0xe   :  { %248 = vmatpush.msra.mxu2 %v45_v6  ;;  %62 = vmatpush.msra.mxu0 %v45_v6  ;;  %v142_v38 = vld [vmem:[%s507_s3 + $0x28] sm:$0xff]  ;;  %v34_v40 = vld [vmem:[%s506_s0 + $0x70] sm:$0xff]  ;;  %v140_v42 = vld [vmem:[%s507_s3 + $0x18] sm:$0xff] }
   0xf   :  { %260 = vmatpush.msra.mxu3 %v150_v26  ;;  %159 = vmatpush.msra.mxu1 %v150_v26  ;;  %v26_v41 = vld [vmem:[%s506_s0 + $0x30] sm:$0xff]  ;;  %v35_v43 = vld [vmem:[%s506_s0 + $0x78] sm:$0xff]  ;;  %v138_v46 = vld [vmem:[%s507_s3 + $0x8] sm:$0xff] }
  0x10   :  { %249 = vmatpush.msra.mxu2 %v44_v7  ;;  %63 = vmatpush.msra.mxu0 %v44_v7  ;;  %v27_v44 = vld [vmem:[%s506_s0 + $0x38] sm:$0xff]  ;;  %v139_v45 = vld [vmem:[%s507_s3 + $0x10] sm:$0xff]  ;;  %v137_v47 = vld [vmem:[%s507_s3] sm:$0xff] }
  0x11   :  { %261 = vmatpush.msra.mxu3 %v149_v27  ;;  %160 = vmatpush.msra.mxu1 %v149_v27  ;;  %v274_v48 = vld [vmem:[%s505_s2] ss:$0 sm:$0xff] }
  0x12   :  { %250 = vmatpush.msra.mxu2 %v43_v8  ;;  %64 = vmatpush.msra.mxu0 %v43_v8 }
  0x13   :  { %262 = vmatpush.msra.mxu3 %v148_v30  ;;  %161 = vmatpush.msra.mxu1 %v148_v30 }
  0x14   :  { %251 = vmatpush.msra.mxu2 %v42_v9  ;;  %65 = vmatpush.msra.mxu0 %v42_v9 }
  0x15   :  { %263 = vmatpush.msra.mxu3 %v147_v31  ;;  %162 = vmatpush.msra.mxu1 %v147_v31 }
  0x16   :  { %252 = vmatpush.msra.mxu2 %v41_v10  ;;  %66 = vmatpush.msra.mxu0 %v41_v10 }
  0x17   :  { %264 = vmatpush.msra.mxu3 %v146_v32  ;;  %163 = vmatpush.msra.mxu1 %v146_v32 }
  0x18   :  { %253 = vmatpush.msra.mxu2 %v40_v11  ;;  %67 = vmatpush.msra.mxu0 %v40_v11 }
  0x19   :  { %265 = vmatpush.msra.mxu3 %v145_v33  ;;  %164 = vmatpush.msra.mxu1 %v145_v33  ;;  %v275_v33 = vld [vmem:[%s508_s4] ss:$0 sm:$0xff] }
  0x1a   :  { %254 = vmatpush.msra.mxu2 %v39_v12  ;;  %68 = vmatpush.msra.mxu0 %v39_v12 }
  0x1b   :  { %266 = vmatpush.msra.mxu3 %v144_v36  ;;  %165 = vmatpush.msra.mxu1 %v144_v36 }
  0x1c   :  { %255 = vmatpush.msra.mxu2 %v38_v13  ;;  %69 = vmatpush.msra.mxu0 %v38_v13 }
  0x1d   :  { %267 = vmatpush.msra.mxu3 %v143_v37  ;;  %166 = vmatpush.msra.mxu1 %v143_v37 }
  0x1e   :  { %256 = vmatpush.msra.mxu2 %v37_v14  ;;  %70 = vmatpush.msra.mxu0 %v37_v14 }
  0x1f   :  { %268 = vmatpush.msra.mxu3 %v142_v38  ;;  %167 = vmatpush.msra.mxu1 %v142_v38 }
  0x20   :  { %257 = vmatpush.msra.mxu2 %v36_v15  ;;  %71 = vmatpush.msra.mxu0 %v36_v15 }
  0x21   :  { %96 = vmatmul.f32.vlgmr.msra.gmra.mxu2 %v28_v16  ;;  %72 = vmatmul.f32.vlgmr.msra.gmra.mxu0 %v20_v17 }
  0x22   :  { %269 = vmatpush.msra.mxu3 %v141_v39  ;;  %168 = vmatpush.msra.mxu1 %v141_v39 }
  0x24   :  { %270 = vmatpush.msra.mxu3 %v140_v42  ;;  %169 = vmatpush.msra.mxu1 %v140_v42 }
  0x26   :  { %271 = vmatpush.msra.mxu3 %v139_v45  ;;  %170 = vmatpush.msra.mxu1 %v139_v45 }
  0x28   :  { %272 = vmatpush.msra.mxu3 %v138_v46  ;;  %171 = vmatpush.msra.mxu1 %v138_v46 }
  0x29   :  { %99 = vmatmul.f32.gmra.mxu2 %v29_v18  ;;  %75 = vmatmul.f32.gmra.mxu0 %v21_v19 }
  0x2a   :  { %273 = vmatpush.msra.mxu3 %v137_v47  ;;  %172 = vmatpush.msra.mxu1 %v137_v47 }
  0x31   :  { %102 = vmatmul.f32.gmra.mxu2 %v30_v20  ;;  %78 = vmatmul.f32.gmra.mxu0 %v22_v21 }
  0x39   :  { %105 = vmatmul.f32.gmra.mxu2 %v31_v22  ;;  %81 = vmatmul.f32.gmra.mxu0 %v23_v23 }
  0x41   :  { %108 = vmatmul.f32.gmra.mxu2 %v32_v28  ;;  %84 = vmatmul.f32.gmra.mxu0 %v24_v29 }
  0x49   :  { %111 = vmatmul.f32.gmra.mxu2 %v33_v34  ;;  %87 = vmatmul.f32.gmra.mxu0 %v25_v35 }
  0x51   :  { %114 = vmatmul.f32.gmra.mxu2 %v34_v40  ;;  %90 = vmatmul.f32.gmra.mxu0 %v26_v41 }
  0x59   :  { %117 = vmatmul.f32.gmra.mxu2 %v35_v43  ;;  %93 = vmatmul.f32.gmra.mxu0 %v27_v44 }
  0x9e   :  { %v73_v49 = vpop.f32.mrf.mxu0 }
  0x9f   :  { %v74_v50 = vadd.f32 %v274_v48, %v73_v49 }
  0xa1   :  { %v121_v51 = vmax.f32 %v74_v50, 0.0 }
  0xa3   :  { %173 = vmatmul.f32.vlgmr.msra.gmra.mxu1 %v121_v51 }
  0xa4   :  { %v97_v52 = vpop.f32.mrf.mxu2 }
  0xa5   :  { %v98_v53 = vadd.f32 %v274_v48, %v97_v52 }
  0xa6   :  { %v76_v54 = vpop.f32.mrf.mxu0 }
  0xa7   :  { %v129_v55 = vmax.f32 %v98_v53, 0.0  ;;  %v77_v56 = vadd.f32 %v274_v48, %v76_v54 }
  0xa9   :  { %197 = vmatmul.f32.vlgmr.msra.gmra.mxu3 %v129_v55  ;;  %v122_v57 = vmax.f32 %v77_v56, 0.0 }
  0xab   :  { %176 = vmatmul.f32.gmra.mxu1 %v122_v57 }
  0xac   :  { %v100_v58 = vpop.f32.mrf.mxu2 }
  0xad   :  { %v101_v59 = vadd.f32 %v274_v48, %v100_v58 }
  0xae   :  { %v79_v60 = vpop.f32.mrf.mxu0 }
  0xaf   :  { %v130_v61 = vmax.f32 %v101_v59, 0.0  ;;  %v80_v62 = vadd.f32 %v274_v48, %v79_v60 }
  0xb1   :  { %200 = vmatmul.f32.gmra.mxu3 %v130_v61  ;;  %v123_v63 = vmax.f32 %v80_v62, 0.0 }
  0xb3   :  { %179 = vmatmul.f32.gmra.mxu1 %v123_v63 }
  0xb4   :  { %v103_v0 = vpop.f32.mrf.mxu2 }
  0xb5   :  { %v104_v1 = vadd.f32 %v274_v48, %v103_v0 }
  0xb6   :  { %v82_v2 = vpop.f32.mrf.mxu0 }
  0xb7   :  { %v131_v3 = vmax.f32 %v104_v1, 0.0  ;;  %v83_v4 = vadd.f32 %v274_v48, %v82_v2 }
  0xb9   :  { %203 = vmatmul.f32.gmra.mxu3 %v131_v3  ;;  %v124_v5 = vmax.f32 %v83_v4, 0.0 }
  0xbb   :  { %182 = vmatmul.f32.gmra.mxu1 %v124_v5 }
  0xbc   :  { %v106_v6 = vpop.f32.mrf.mxu2 }
  0xbd   :  { %v107_v7 = vadd.f32 %v274_v48, %v106_v6 }
  0xbe   :  { %v85_v8 = vpop.f32.mrf.mxu0 }
  0xbf   :  { %v132_v9 = vmax.f32 %v107_v7, 0.0  ;;  %v86_v10 = vadd.f32 %v274_v48, %v85_v8 }
  0xc1   :  { %206 = vmatmul.f32.gmra.mxu3 %v132_v9  ;;  %v125_v11 = vmax.f32 %v86_v10, 0.0 }
  0xc3   :  { %185 = vmatmul.f32.gmra.mxu1 %v125_v11 }
  0xc4   :  { %v109_v12 = vpop.f32.mrf.mxu2 }
  0xc5   :  { %v110_v13 = vadd.f32 %v274_v48, %v109_v12 }
  0xc6   :  { %v88_v14 = vpop.f32.mrf.mxu0 }
  0xc7   :  { %v133_v15 = vmax.f32 %v110_v13, 0.0  ;;  %v89_v16 = vadd.f32 %v274_v48, %v88_v14 }
  0xc9   :  { %209 = vmatmul.f32.gmra.mxu3 %v133_v15  ;;  %v126_v17 = vmax.f32 %v89_v16, 0.0 }
  0xcb   :  { %188 = vmatmul.f32.gmra.mxu1 %v126_v17 }
  0xcc   :  { %v112_v18 = vpop.f32.mrf.mxu2 }
  0xcd   :  { %v113_v19 = vadd.f32 %v274_v48, %v112_v18 }
  0xce   :  { %v91_v20 = vpop.f32.mrf.mxu0 }
  0xcf   :  { %v134_v21 = vmax.f32 %v113_v19, 0.0  ;;  %v92_v22 = vadd.f32 %v274_v48, %v91_v20 }
  0xd1   :  { %212 = vmatmul.f32.gmra.mxu3 %v134_v21  ;;  %v127_v23 = vmax.f32 %v92_v22, 0.0 }
  0xd3   :  { %191 = vmatmul.f32.gmra.mxu1 %v127_v23 }
  0xd4   :  { %v115_v24 = vpop.f32.mrf.mxu2 }
  0xd5   :  { %v116_v25 = vadd.f32 %v274_v48, %v115_v24 }
  0xd6   :  { %v94_v26 = vpop.f32.mrf.mxu0 }
  0xd7   :  { %v135_v27 = vmax.f32 %v116_v25, 0.0  ;;  %v95_v28 = vadd.f32 %v274_v48, %v94_v26 }
  0xd9   :  { %215 = vmatmul.f32.gmra.mxu3 %v135_v27  ;;  %v128_v29 = vmax.f32 %v95_v28, 0.0 }
  0xdb   :  { %194 = vmatmul.f32.gmra.mxu1 %v128_v29 }
  0xdc   :  { %v118_v30 = vpop.f32.mrf.mxu2 }
  0xdd   :  { %v119_v31 = vadd.f32 %v274_v48, %v118_v30 }
  0xdf   :  { %v136_v32 = vmax.f32 %v119_v31, 0.0 }
  0xe1   :  { %218 = vmatmul.f32.gmra.mxu3 %v136_v32 }
 0x120   :  { %v174_v34 = vpop.f32.mrf.mxu1 }
 0x121   :  { %v175_v35 = vadd.f32 %v275_v33, %v174_v34 }
 0x123   :  { %222 = vst [vmem:[%s509_s5] sm:$0xff] %v175_v35 }
 0x128   :  { %v177_v36 = vpop.f32.mrf.mxu1 }
 0x129   :  { %v178_v37 = vadd.f32 %v275_v33, %v177_v36 }
 0x12b   :  { %223 = vst [vmem:[%s509_s5 + $0x8] sm:$0xff] %v178_v37 }
 0x12c   :  { %v198_v38 = vpop.f32.mrf.mxu3 }
 0x12d   :  { %v199_v39 = vadd.f32 %v275_v33, %v198_v38 }
 0x12f   :  { %230 = vst [vmem:[%s509_s5 + $0x40] sm:$0xff] %v199_v39 }
 0x130   :  { %v180_v40 = vpop.f32.mrf.mxu1 }
 0x131   :  { %v181_v41 = vadd.f32 %v275_v33, %v180_v40 }
 0x133   :  { %224 = vst [vmem:[%s509_s5 + $0x10] sm:$0xff] %v181_v41 }
 0x134   :  { %v201_v42 = vpop.f32.mrf.mxu3 }
 0x135   :  { %v202_v43 = vadd.f32 %v275_v33, %v201_v42 }
 0x137   :  { %231 = vst [vmem:[%s509_s5 + $0x48] sm:$0xff] %v202_v43 }
 0x138   :  { %v183_v44 = vpop.f32.mrf.mxu1 }
 0x139   :  { %v184_v45 = vadd.f32 %v275_v33, %v183_v44 }
 0x13b   :  { %225 = vst [vmem:[%s509_s5 + $0x18] sm:$0xff] %v184_v45 }
 0x13c   :  { %v204_v46 = vpop.f32.mrf.mxu3 }
 0x13d   :  { %v205_v47 = vadd.f32 %v275_v33, %v204_v46 }
 0x13f   :  { %232 = vst [vmem:[%s509_s5 + $0x50] sm:$0xff] %v205_v47 }
 0x140   :  { %v186_v48 = vpop.f32.mrf.mxu1 }
 0x141   :  { %v187_v49 = vadd.f32 %v275_v33, %v186_v48 }
 0x143   :  { %226 = vst [vmem:[%s509_s5 + $0x20] sm:$0xff] %v187_v49 }
 0x144   :  { %v207_v50 = vpop.f32.mrf.mxu3 }
 0x145   :  { %v208_v51 = vadd.f32 %v275_v33, %v207_v50 }
 0x147   :  { %233 = vst [vmem:[%s509_s5 + $0x58] sm:$0xff] %v208_v51 }
 0x148   :  { %v189_v52 = vpop.f32.mrf.mxu1 }
 0x149   :  { %v190_v53 = vadd.f32 %v275_v33, %v189_v52 }
 0x14b   :  { %227 = vst [vmem:[%s509_s5 + $0x28] sm:$0xff] %v190_v53 }
 0x14c   :  { %v210_v54 = vpop.f32.mrf.mxu3 }
 0x14d   :  { %v211_v55 = vadd.f32 %v275_v33, %v210_v54 }
 0x14f   :  { %234 = vst [vmem:[%s509_s5 + $0x60] sm:$0xff] %v211_v55 }
 0x150   :  { %v192_v56 = vpop.f32.mrf.mxu1 }
 0x151   :  { %v193_v57 = vadd.f32 %v275_v33, %v192_v56 }
 0x153   :  { %228 = vst [vmem:[%s509_s5 + $0x30] sm:$0xff] %v193_v57 }
 0x154   :  { %v213_v58 = vpop.f32.mrf.mxu3 }
 0x155   :  { %v214_v59 = vadd.f32 %v275_v33, %v213_v58 }
 0x157   :  { %235 = vst [vmem:[%s509_s5 + $0x68] sm:$0xff] %v214_v59 }
 0x158   :  { %v195_v60 = vpop.f32.mrf.mxu1 }
 0x159   :  { %v196_v61 = vadd.f32 %v275_v33, %v195_v60 }
 0x15b   :  { %229 = vst [vmem:[%s509_s5 + $0x38] sm:$0xff] %v196_v61 }
 0x15c   :  { %v216_v62 = vpop.f32.mrf.mxu3 }
 0x15d   :  { %v217_v63 = vadd.f32 %v275_v33, %v216_v62 }
 0x15f   :  { %236 = vst [vmem:[%s509_s5 + $0x70] sm:$0xff] %v217_v63 }
 0x164   :  { %v219_v0 = vpop.f32.mrf.mxu3 }
 0x165   :  { %v220_v1 = vadd.f32 %v275_v33, %v219_v0 }
 0x167   :  { %237 = vst [vmem:[%s509_s5 + $0x78] sm:$0xff] %v220_v1 }

</bundles_post_ra>
